<compile_context>
chip_gen: v6e
topology: v6e:2x2x1
jax: 0.10.0
libtpu: 0.0.40
codegen_flags: <defaults>
</compile_context>

<pallas_src>
import functools
import math

import jax
import jax.numpy as jnp
from jax.experimental import pallas as pl
from jax.experimental.pallas import tpu as pltpu

INF = 1e10


def _round_up(x, m):
    return ((x + m - 1) // m) * m


def _choose_tile(dim, pref=512):
    """Return (tile, padded_dim). Prefers exact divisors; else pads to tile."""
    if dim <= pref:
        return dim, dim
    for t in (pref, 256, 128):
        if t <= pref and dim % t == 0:
            return t, dim
    return pref, _round_up(dim, pref)


@functools.lru_cache(maxsize=1)
def _vmem_limit_bytes():
    """Scoped VMEM budget: ~3/4 of physical VMEM (v5e/v6e: 96 MiB, v7x: 48 MiB)."""
    try:
        cap = pltpu.get_tpu_info().vmem_capacity_bytes
    except Exception:
        cap = 64 << 20  # conservative fallback (v7x-sized)
    return int(min(cap * 3 // 4, 96 << 20))


# ---------------------------------------------------------------------------
# Tiled, K-accumulating linear (bias-free). Operands arrive in compute dtype
# (bf16) -> no in-kernel casts; f32 VMEM accumulator.
# ---------------------------------------------------------------------------
def _linear_kernel(x_ref, w_ref, o_ref, acc_ref):
    @pl.when(pl.program_id(2) == 0)
    def _init():
        acc_ref[...] = jnp.zeros_like(acc_ref)

    acc_ref[...] += jnp.dot(x_ref[...], w_ref[...],
                            preferred_element_type=jnp.float32)

    @pl.when(pl.program_id(2) == pl.num_programs(2) - 1)
    def _done():
        o_ref[...] = acc_ref[...].astype(o_ref.dtype)


def linear_nobias(x, w, *, out_dtype):
    """x: [..., K] @ w: [K, N] -> [..., N]; x/w already in compute dtype."""
    lead = x.shape[:-1]
    K = x.shape[-1]
    N = w.shape[1]
    x2 = x.reshape(-1, K)
    M = x2.shape[0]

    tm, Mp = _choose_tile(M)
    tn, Np = _choose_tile(N)
    tk, Kp = _choose_tile(K)
    if Mp != M or Kp != K:
        x2 = jnp.pad(x2, ((0, Mp - M), (0, Kp - K)))
    if Kp != K or Np != N:
        w = jnp.pad(w, ((0, Kp - K), (0, Np - N)))

    y = pl.pallas_call(
        _linear_kernel,
        out_shape=jax.ShapeDtypeStruct((Mp, Np), out_dtype),
        grid=(Mp // tm, Np // tn, Kp // tk),
        in_specs=[
            pl.BlockSpec((tm, tk), lambda i, j, k: (i, k)),
            pl.BlockSpec((tk, tn), lambda i, j, k: (k, j)),
        ],
        out_specs=pl.BlockSpec((tm, tn), lambda i, j, k: (i, j)),
        scratch_shapes=[pltpu.VMEM((tm, tn), jnp.float32)],
        compiler_params=pltpu.CompilerParams(
            dimension_semantics=("parallel", "parallel", "arbitrary"),
            vmem_limit_bytes=_vmem_limit_bytes(),
        ),
    )(x2, w)
    if Mp != M or Np != N:
        y = y[:M, :N]
    return y.reshape(*lead, N)


# ---------------------------------------------------------------------------
# Multi-head attention: grid (batch, q-block, kv-block); all heads inside the
# kernel; flash-style online softmax over kv blocks; concat-layout dense
# output store with fused normalization.
# ---------------------------------------------------------------------------
def _mha_flash_kernel(q_ref, k_ref, v_ref, o_ref, m_sc, l_sc, acc_sc, *,
                      n_heads, causal, lk_valid, kv_padded):
    qi = pl.program_id(1)
    kb = pl.program_id(2)
    q_block = q_ref.shape[1]
    kv_block = k_ref.shape[1]
    d_key = q_ref.shape[2]
    d_value = v_ref.shape[2]
    dh = d_key // n_heads
    dvh = d_value // n_heads

    @pl.when(kb == 0)
    def _init():
        m_sc[...] = jnp.full(m_sc.shape, -jnp.inf, jnp.float32)
        l_sc[...] = jnp.zeros(l_sc.shape, jnp.float32)
        acc_sc[...] = jnp.zeros(acc_sc.shape, jnp.float32)

    def _compute():
        # NOTE: 1/sqrt(d_key) (FULL width, as in Attention(d_key, ...)) is
        # folded into wq on the host, so q is already scaled.
        q = q_ref[0]            # [q_block, d_key]  bf16
        k = k_ref[0]            # [kv_block, d_key] bf16
        v = v_ref[0]            # [kv_block, d_value] bf16
        m_prev = m_sc[...]      # [q_block, n_heads] f32
        l_prev = l_sc[...]      # [q_block, n_heads] f32

        mask = None
        if causal or kv_padded:
            cols = jax.lax.broadcasted_iota(
                jnp.int32, (q_block, kv_block), 1) + kb * kv_block
            if causal:
                rows = jax.lax.broadcasted_iota(
                    jnp.int32, (q_block, kv_block), 0) + qi * q_block
                mask = cols > rows
                if kv_padded:
                    mask = jnp.logical_or(mask, cols >= lk_valid)
            else:
                mask = cols >= lk_valid

        m_cols, l_cols, a_cols, pv_cols = [], [], [], []
        for h in range(n_heads):
            qh = q[:, h * dh:(h + 1) * dh]
            kh = k[:, h * dh:(h + 1) * dh]
            vh = v[:, h * dvh:(h + 1) * dvh]
            # s = qh @ kh^T, f32 accumulate on the MXU (no explicit transpose).
            s = jax.lax.dot_general(
                qh, kh, (((1,), (1,)), ((), ())),
                preferred_element_type=jnp.float32)          # [q_block, kv_block]
            if mask is not None:
                s = jnp.where(mask, s - INF, s)
            mp = m_prev[:, h:h + 1]
            mn = jnp.maximum(mp, jnp.max(s, axis=-1, keepdims=True))
            alpha = jnp.exp(mp - mn)                         # [q_block, 1]
            p = jnp.exp(s - mn)                              # [q_block, kv_block]
            ln = alpha * l_prev[:, h:h + 1] + jnp.sum(p, axis=-1, keepdims=True)
            pv = jnp.dot(p.astype(v.dtype), vh,
                         preferred_element_type=jnp.float32)  # [q_block, dvh]
            m_cols.append(mn)
            l_cols.append(ln)
            a_cols.append(jnp.broadcast_to(alpha, (q_block, dvh)))
            pv_cols.append(pv)

        # Lane-dense, full-width scratch updates (one RMW per kv step).
        m_sc[...] = jnp.concatenate(m_cols, axis=-1)
        l_sc[...] = jnp.concatenate(l_cols, axis=-1)
        acc_sc[...] = (jnp.concatenate(a_cols, axis=-1) * acc_sc[...]
                       + jnp.concatenate(pv_cols, axis=-1))

    if causal:
        # Skip kv blocks that are fully masked for this q tile.
        @pl.when(kb * kv_block <= qi * q_block + (q_block - 1))
        def _():
            _compute()
    else:
        _compute()

    # TODO(synk): dropout on attention probabilities is identity (eval mode).

    @pl.when(kb == pl.num_programs(2) - 1)
    def _done():
        inv_l = pl.reciprocal(l_sc[...], approx=True)        # [q_block, n_heads]
        inv_full = jnp.concatenate(
            [jnp.broadcast_to(inv_l[:, h:h + 1], (q_block, dvh))
             for h in range(n_heads)], axis=-1)
        o_ref[0] = (acc_sc[...] * inv_full).astype(o_ref.dtype)  # single dense store


def _attention_all_heads(qp, kp, vp, n_heads, causal, out_dtype):
    B, Lq, d_key = qp.shape
    _, Lk, d_value = vp.shape

    q_block, Lq_pad = _choose_tile(Lq)
    kv_block, Lk_pad = _choose_tile(Lk)
    if Lq_pad != Lq:
        qp = jnp.pad(qp, ((0, 0), (0, Lq_pad - Lq), (0, 0)))
    if Lk_pad != Lk:
        kp = jnp.pad(kp, ((0, 0), (0, Lk_pad - Lk), (0, 0)))
        vp = jnp.pad(vp, ((0, 0), (0, Lk_pad - Lk), (0, 0)))

    kern = functools.partial(
        _mha_flash_kernel, n_heads=n_heads, causal=causal,
        lk_valid=Lk, kv_padded=(Lk_pad != Lk))

    out = pl.pallas_call(
        kern,
        out_shape=jax.ShapeDtypeStruct((B, Lq_pad, d_value), out_dtype),
        grid=(B, Lq_pad // q_block, Lk_pad // kv_block),
        in_specs=[
            pl.BlockSpec((1, q_block, d_key), lambda b, qi, kb: (b, qi, 0)),
            pl.BlockSpec((1, kv_block, d_key), lambda b, qi, kb: (b, kb, 0)),
            pl.BlockSpec((1, kv_block, d_value), lambda b, qi, kb: (b, kb, 0)),
        ],
        out_specs=pl.BlockSpec((1, q_block, d_value), lambda b, qi, kb: (b, qi, 0)),
        scratch_shapes=[
            pltpu.VMEM((q_block, n_heads), jnp.float32),   # running max m (heads on lanes)
            pltpu.VMEM((q_block, n_heads), jnp.float32),   # running sum l
            pltpu.VMEM((q_block, d_value), jnp.float32),   # acc (concat layout)
        ],
        compiler_params=pltpu.CompilerParams(
            dimension_semantics=("parallel", "parallel", "arbitrary"),
            vmem_limit_bytes=_vmem_limit_bytes(),
        ),
    )(qp, kp, vp)
    if Lq_pad != Lq:
        out = out[:, :Lq, :]
    return out


# ---------------------------------------------------------------------------
# MultiHead.forward (eval mode)
# ---------------------------------------------------------------------------
def multi_head_forward(query, key, value, params, n_heads, causal=False,
                       compute_dtype=jnp.bfloat16, out_dtype=jnp.float32):
    wq_t, wk_t, wv_t, wo_t = params      # stored as [in, out] (= torch W.T)
    d_key = wq_t.shape[1]
    d_value = wv_t.shape[1]
    dvh = d_value // n_heads
    if causal:
        assert query.shape[1] == key.shape[1], "causal mask assumes Lq == Lk"

    scale = math.sqrt(d_key)
    # Fold 1/sqrt(d_key) into wq once; cast all weights / activations to bf16
    # once (halves all intermediate HBM traffic; MXU accumulates in f32).
    wq_c = (wq_t / scale).astype(compute_dtype)
    wk_c = wk_t.astype(compute_dtype)
    wv_c = wv_t.astype(compute_dtype)
    wo_c = wo_t.astype(compute_dtype)
    q_in = query.astype(compute_dtype)
    k_in = key.astype(compute_dtype)
    v_in = value.astype(compute_dtype)

    # TODO(synk): wq/wk/wv are not fused into one matmul because query/key/value
    #             may be distinct tensors (cross-attention); fuse when they alias.
    qp = linear_nobias(q_in, wq_c, out_dtype=compute_dtype)   # [B, Lq, d_key] (pre-scaled)
    kp = linear_nobias(k_in, wk_c, out_dtype=compute_dtype)   # [B, Lk, d_key]
    vp = linear_nobias(v_in, wv_c, out_dtype=compute_dtype)   # [B, Lk, d_value]

    # attention over all heads, output in concat [B, Lq, d_value] layout (bf16)
    concat = _attention_all_heads(qp, kp, vp, n_heads, causal,
                                  out_dtype=compute_dtype)

    attention_out = linear_nobias(concat, wo_c, out_dtype=out_dtype)  # [B, Lq, d_key]
    concat_full = concat.astype(out_dtype)
    attention_outputs = [concat_full[..., h * dvh:(h + 1) * dvh]
                         for h in range(n_heads)]
    return attention_out, attention_outputs


# ---------------------------------------------------------------------------
# Pure-JAX f32 reference (for correctness check)
# ---------------------------------------------------------------------------
def reference_forward(query, key, value, params, n_heads):
    wq_t, wk_t, wv_t, wo_t = params
    d_key = wq_t.shape[1]
    d_value = wv_t.shape[1]
    dh = d_key // n_heads
    dvh = d_value // n_heads
    scale = math.sqrt(d_key)
    qp, kp, vp = query @ wq_t, key @ wk_t, value @ wv_t
    outs = []
    for h in range(n_heads):
        q = qp[..., h * dh:(h + 1) * dh]
        k = kp[..., h * dh:(h + 1) * dh]
        v = vp[..., h * dvh:(h + 1) * dvh]
        dots = jnp.einsum("bqd,bkd->bqk", q, k) / scale
        p = jax.nn.softmax(dots, axis=-1)
        outs.append(jnp.einsum("bqk,bkd->bqd", p, v))
    return jnp.concatenate(outs, -1) @ wo_t, outs


# ---------------------------------------------------------------------------
if __name__ == "__main__":
    B, L = 2, 8
    d_key, d_value, n_heads = 32, 32, 4

    key0 = jax.random.PRNGKey(0)
    kq, kk, kv, kwq, kwk, kwv, kwo = jax.random.split(key0, 7)

    def init_w(k, fan_in, fan_out):
        bound = 1.0 / math.sqrt(fan_in)
        # stored transposed: [in, out] (torch Linear weight is [out, in])
        return jax.random.uniform(k, (fan_in, fan_out), jnp.float32, -bound, bound)

    params = (
        init_w(kwq, d_key, d_key),      # wq
        init_w(kwk, d_key, d_key),      # wk
        init_w(kwv, d_value, d_value),  # wv
        init_w(kwo, d_value, d_key),    # wo
    )

    query = jax.random.normal(kq, (B, L, d_key), jnp.float32)
    key_ = jax.random.normal(kk, (B, L, d_key), jnp.float32)
    value = jax.random.normal(kv, (B, L, d_value), jnp.float32)

    out, head_outs = multi_head_forward(query, key_, value, params, n_heads)
    out = jax.block_until_ready(out)
    head_outs = [jax.block_until_ready(h) for h in head_outs]

    ref_out, ref_heads = reference_forward(query, key_, value, params, n_heads)

    assert out.shape == (B, L, d_key)
    assert len(head_outs) == n_heads
    assert all(h.shape == (B, L, d_value // n_heads) for h in head_outs)
    assert not bool(jnp.any(jnp.isnan(out)))
    # bf16 activations/MXU operands (f32 accumulate/softmax) vs. f32 reference
    assert jnp.allclose(out, ref_out, atol=5e-2, rtol=5e-2)
    for h, rh in zip(head_outs, ref_heads):
        assert jnp.allclose(h, rh, atol=5e-2, rtol=5e-2)

    print("KERNEL_OK")
</pallas_src>

<mosaic_0001>
module attributes {stable_mosaic.version = 11 : i64} {
  func.func @_linear_kernel(%arg0: i32, %arg1: i32, %arg2: i32, %arg3: memref<16x32xbf16, #tpu.memory_space<vmem>>, %arg4: memref<32x32xbf16, #tpu.memory_space<vmem>>, %arg5: memref<16x32xbf16, #tpu.memory_space<vmem>>, %arg6: memref<16x32xf32, #tpu.memory_space<vmem>>) attributes {dimension_semantics = [#tpu.dimension_semantics<parallel>, #tpu.dimension_semantics<parallel>, #tpu.dimension_semantics<arbitrary>], iteration_bounds = array<i64: 1, 1, 1>, scalar_prefetch = 0 : i64, scratch_operands = 1 : i64, tpu.core_type = #tpu.core_type<tc>, window_params = [{transform_indices = @transform_0, window_bounds = array<i64: 16, 32>}, {transform_indices = @transform_1, window_bounds = array<i64: 32, 32>}, {transform_indices = @transform_2, window_bounds = array<i64: 16, 32>}]} {
    %c0_i32 = arith.constant 0 : i32
    %0 = arith.cmpi eq, %arg2, %c0_i32 : i32
    %1 = arith.extui %0 : i1 to i32
    %c0_i32_0 = arith.constant 0 : i32
    %2 = arith.cmpi ne, %1, %c0_i32_0 : i32
    scf.if %2 {
      %cst_10 = arith.constant 0.000000e+00 : f32
      %12 = vector.broadcast %cst_10 : f32 to vector<16x32xf32>
      %c0_11 = arith.constant 0 : index
      %c0_12 = arith.constant 0 : index
      %13 = vector.load %arg6[%c0_11, %c0_12] : memref<16x32xf32, #tpu.memory_space<vmem>>, vector<16x32xf32>
      tpu.vector_store %arg6[%c0_11, %c0_12], %12 {strides = array<i32>} : memref<16x32xf32, #tpu.memory_space<vmem>>, vector<16x32xf32>,
    } else {
    }
    %c0 = arith.constant 0 : index
    %c0_1 = arith.constant 0 : index
    %3 = vector.load %arg6[%c0, %c0_1] : memref<16x32xf32, #tpu.memory_space<vmem>>, vector<16x32xf32>
    %c0_2 = arith.constant 0 : index
    %c0_3 = arith.constant 0 : index
    %4 = vector.load %arg3[%c0_2, %c0_3] : memref<16x32xbf16, #tpu.memory_space<vmem>>, vector<16x32xbf16>
    %c0_4 = arith.constant 0 : index
    %c0_5 = arith.constant 0 : index
    %5 = vector.load %arg4[%c0_4, %c0_5] : memref<32x32xbf16, #tpu.memory_space<vmem>>, vector<32x32xbf16>
    %cst = arith.constant dense<0.000000e+00> : vector<16x32xf32>
    %6 = tpu.matmul %4, %5, %cst {dimension_numbers = #tpu.dot_dimension_numbers<[1], [0], [0], [1], [0, 0, 1, 1], [], []>} : vector<16x32xbf16>, vector<32x32xbf16>, vector<16x32xf32> -> vector<16x32xf32>
    %7 = arith.addf %3, %6 : vector<16x32xf32>
    %c0_6 = arith.constant 0 : index
    %c0_7 = arith.constant 0 : index
    %8 = vector.load %arg6[%c0_6, %c0_7] : memref<16x32xf32, #tpu.memory_space<vmem>>, vector<16x32xf32>
    tpu.vector_store %arg6[%c0_6, %c0_7], %7 {strides = array<i32>} : memref<16x32xf32, #tpu.memory_space<vmem>>, vector<16x32xf32>,
    %c0_i32_8 = arith.constant 0 : i32
    %9 = arith.cmpi eq, %arg2, %c0_i32_8 : i32
    %10 = arith.extui %9 : i1 to i32
    %c0_i32_9 = arith.constant 0 : i32
    %11 = arith.cmpi ne, %10, %c0_i32_9 : i32
    scf.if %11 {
      %c0_10 = arith.constant 0 : index
      %c0_11 = arith.constant 0 : index
      %12 = vector.load %arg6[%c0_10, %c0_11] : memref<16x32xf32, #tpu.memory_space<vmem>>, vector<16x32xf32>
      %13 = arith.truncf %12 : vector<16x32xf32> to vector<16x32xbf16>
      %c0_12 = arith.constant 0 : index
      %c0_13 = arith.constant 0 : index
      %14 = vector.load %arg5[%c0_12, %c0_13] : memref<16x32xbf16, #tpu.memory_space<vmem>>, vector<16x32xbf16>
      tpu.vector_store %arg5[%c0_12, %c0_13], %13 {strides = array<i32>} : memref<16x32xbf16, #tpu.memory_space<vmem>>, vector<16x32xbf16>,
    } else {
    }
    return
  }
  func.func @transform_0(%arg0: i32, %arg1: i32, %arg2: i32) -> (i32, i32) {
    %c0_i32 = arith.constant 0 : i32
    return %arg0, %arg2 : i32, i32
  }
  func.func @transform_1(%arg0: i32, %arg1: i32, %arg2: i32) -> (i32, i32) {
    %c0_i32 = arith.constant 0 : i32
    return %arg2, %arg1 : i32, i32
  }
  func.func @transform_2(%arg0: i32, %arg1: i32, %arg2: i32) -> (i32, i32) {
    %c0_i32 = arith.constant 0 : i32
    return %arg0, %arg1 : i32, i32
  }
}

</mosaic_0001>

<bundles_post_ra>
// kernel: tpu_custom_call.1
= control target key start
LH: loop header
LB: loop body
LE: loop exit
PB: predicated region body
PF: predicated region fallthrough
CT: control target
= control target key end

     0   :  { %7 = vsyncpa [#allocation4], 0  ;;  %s296_s0 = inlined_call_operand.hbm [shape: bf16[16,32], index: 0, kind: input, shape index: {}]   ;;  %s297_s1 = inlined_call_operand.hbm [shape: bf16[32,32], index: 1, kind: input, shape index: {}]   ;;  %s298_s2 = inlined_call_operand.hbm [shape: bf16[16,32], index: 2, kind: output, shape index: {}]  }
   0x1   :  { %8 = vsyncpa [#allocation7], 0 }
   0x2   :  { %9 = vsyncpa [#allocation5], 0  ;;  %s251_s9 = smov [#allocation3]  }
   0x3   :  { %s15_s10 = sshll.u32 %s251_s9, 4  ;;  %s16_s10 = int_to_ptr.vmem [resolvable:$true] %s15_s10 }
   0x4   :  { %s193_s11 = scalar_lea.vmem %s16_s10, 128  ;;  %p198_p1 = scmp.lt.s32.totalorder %s16_s10, %s16_s10 }
   0x5   :  { %p194_p0 = scmp.ne.s32.totalorder %s16_s10, %s193_s11  ;;  %p199_p2 = scmp.lt.s32.totalorder %s193_s11, %s193_s11 }
   0x7   :  { %p200_p3 = por %p199_p2, %p198_p1 }
   0x9   :  { %p201_p4 = pnand %p200_p3, %p194_p0 }
   0xb   :  { %204 = shalt.err (!%p201_p4)
}
   0xc   :  { %s252_s12 = smov 64   ;;  %s253_s13 = smov 4  }
   0xd   :  { %21 = dma.hbm_to_vmem [thread:$0]  %s296_s0, 128, %s16_s10, [#allocation4], %s252_s12, %s252_s12, %s253_s13  }
   0xe   :  { %s254_s16 = smov [#allocation6]  }
   0xf   :  { %s27_s17 = sshll.u32 %s254_s16, 4  ;;  %s28_s17 = int_to_ptr.vmem [resolvable:$true] %s27_s17 }
  0x10   :  { %s213_s18 = scalar_lea.vmem %s28_s17, 256  ;;  %p218_p6 = scmp.lt.s32.totalorder %s28_s17, %s28_s17 }
  0x11   :  { %p214_p5 = scmp.ne.s32.totalorder %s28_s17, %s213_s18  ;;  %p219_p7 = scmp.lt.s32.totalorder %s213_s18, %s213_s18 }
  0x13   :  { %p220_p8 = por %p219_p7, %p218_p6 }
  0x15   :  { %p221_p9 = pnand %p220_p8, %p214_p5 }
  0x17   :  { %224 = shalt.err (!%p221_p9)
}
  0x18   :  { %33 = dma.hbm_to_vmem [thread:$0]  %s297_s1, 256, %s28_s17, [#allocation7], %s252_s12, %s252_s12, %s253_s13  }
  0x19   :  { %245 = dma.done.wait [#allocation4], 128  }
  0x1a   :  { %246 = vsyncadd [#allocation4], 4294967168 }
  0x1b   :  { %247 = dma.done.wait [#allocation7], 256  }
  0x1c   :  { %248 = vsyncadd [#allocation7], 4294967040  ;;  %vm45_vm0 = vcmask 261120   ;;  %v255_v0 = vmov 0.0   ;;  %vm256_vm1 = vmmov 0   ;;  %v182_v1 = vld [vmem:[#allocation6 + $0x8] sm:$0xff]  }
  0x1d   :  { %167 = vmatprep.subr.bf16.mxu0 %v255_v0  ;;  %171 = vmatprep.mubr.msk.bf16.mxu0 %vm256_vm1, %v255_v0  ;;  %46 = vst.msk [vmem:[#allocation2] sm:$0xff] %vm45_vm0, %v255_v0  ;;  %47 = vst.msk [vmem:[#allocation2 + $0x8] sm:$0xff] %vm45_vm0, %v255_v0  ;;  %v183_v2 = vld [vmem:[#allocation6] sm:$0xff]   ;;  %v184_v3 = vld [vmem:[#allocation3] sm:$0xff]   ;;  %vm135_vm2 = vcmask 257024   ;;  %s257_s0 = smov [#allocation8]  }
  0x1e   :  { %168 = vmatpush3.bf16.msra.mxu0 %v182_v1  ;;  %s143_s1 = sshll.u32 %s257_s0, 4  ;;  %s144_s1 = int_to_ptr.vmem [resolvable:$true] %s143_s1 }
  0x1f   :  { %169 = vmatprep.subr.bf16.mxu0 %v255_v0  ;;  %s225_s21 = scalar_lea.vmem %s144_s1, 128  ;;  %p230_p11 = scmp.lt.s32.totalorder %s144_s1, %s144_s1 }
  0x20   :  { %p226_p10 = scmp.ne.s32.totalorder %s144_s1, %s225_s21  ;;  %p231_p12 = scmp.lt.s32.totalorder %s225_s21, %s225_s21 }
  0x22   :  { %170 = vmatpush3.bf16.msra.mxu0 %v183_v2  ;;  %p232_p13 = por %p231_p12, %p230_p11 }
  0x24   :  { %v48_v4 = vld [vmem:[#allocation2] sm:$0xff]  ;;  %v49_v8 = vld [vmem:[#allocation2 + $0x8] sm:$0xff]  ;;  %p233_p0 = pnand %p232_p13, %p226_p10 }
  0x25   :  { %172 = vmatmul.mubr.msk.bf16.vlgmr.msra.gmra.mxu0 %vm45_vm0, %v184_v3 }
  0xe5   :  { %v111_v5 = vpop.f32.mrf.mxu0 }
  0xe6   :  { %v118_v6 = vadd.f32 %v111_v5, %v48_v4 }
  0xe7   :  { %v173_v7 = vpop.f32.mrf.mxu0 }
  0xe8   :  { %120 = vst.msk [vmem:[#allocation2] sm:$0xff] %vm45_vm0, %v118_v6 }
  0xe9   :  { %v114_v9 = vpop.f32.mrf.mxu0 }
  0xea   :  { %v119_v10 = vadd.f32 %v114_v9, %v49_v8 }
  0xeb   :  { %v174_v11 = vpop.f32.mrf.mxu0 }
  0xec   :  { %121 = vst.msk [vmem:[#allocation2 + $0x8] sm:$0xff] %vm45_vm0, %v119_v10 }
  0xef   :  { %v125_v12 = vld [vmem:[#allocation2] sm:$0xff] }
  0xf0   :  { %v162_v13 = vpack.c.bf16 %v125_v12, %v125_v12 }
  0xf2   :  { %136 = vst.msk [vmem:[#allocation8] sm:$0xf] %vm135_vm2, %v162_v13 }
  0xf3   :  { %v126_v14 = vld [vmem:[#allocation2 + $0x8] sm:$0xff] }
  0xf4   :  { %v163_v15 = vpack.c.bf16 %v126_v14, %v126_v14 }
  0xf6   :  { %137 = vst.msk [vmem:[#allocation8 + $0x4] sm:$0xf] %vm135_vm2, %v163_v15 }
  0xf7   :  { %236 = shalt.err (!%p233_p0)
}
  0xf8   :  { %149 = dma.vmem_to_hbm [thread:$0]  %s144_s1, 128, %s298_s2, [#allocation5], %s252_s12, %s252_s12, %s253_s13  }
  0xf9   :  { %249 = dma.done.wait [#allocation5], 128  }
  0xfa   :  { %250 = vsyncadd [#allocation5], 4294967168 }
  0xfb   :  { %153 = vsyncpa [#allocation4], 1 }
  0xfc   :  { %154 = vsyncpa [#allocation7], 1 }
  0xfd   :  { %155 = vsyncpa [#allocation5], 1 }

</bundles_post_ra>
